<compile_context>
chip_gen: v7x
topology: tpu7x:2x2x1
jax: 0.10.0
libtpu: 0.0.40
codegen_flags: <defaults>
</compile_context>

<pallas_src>
import functools

import jax
import jax.numpy as jnp
from jax.experimental import pallas as pl
from jax.experimental.pallas import tpu as pltpu


# ----------------------------------------------------------------------------
# Kernel 1: fused Sigmoid normalization + threshold filtering (full image)
#   final_input = sigmoid(pred)
#   final_input[ sigmoid(pred) >= filter_p & target > 0.5 ] = 1.0
#   final_input[ sigmoid(pred) <= filter_p & target < 0.5 ] = 0.0
# ----------------------------------------------------------------------------
def _filter_kernel(pred_ref, target_ref, out_ref, *, filter_p):
    # Cast inside the kernel: HBM traffic stays at the input dtype (bf16-friendly),
    # compute is f32 (v5e has no bf16 VPU/EUP path).
    p = jax.nn.sigmoid(pred_ref[...].astype(jnp.float32))
    t = target_ref[...].astype(jnp.float32)
    fi = jnp.where((p >= filter_p) & (t > 0.5), 1.0, p)
    fi = jnp.where((p <= filter_p) & (t < 0.5), 0.0, fi)
    out_ref[...] = fi.astype(out_ref.dtype)


def _row_tile(rows):
    """Pick the row-tile for the lane-dense (rows, 128) layout.

    Block bytes = tr * 128 * 4; 3 arrays x 2 buffers double-buffered footprint.
      v5-class (default scoped VMEM 16 MiB): tr=4096 -> 12 MiB, default limit.
      v6e/v7x: tr=8192 -> 24 MiB, explicit vmem_limit_bytes (48 MiB, < v7x 64 MiB
      physical) so the footprint never trips a lowered scoped default.
    """
    kind = ""
    try:
        kind = jax.devices()[0].device_kind.lower()
    except Exception:
        pass
    old_gen = any(v in kind for v in ("v2", "v3", "v4", "v5"))
    if old_gen:
        pref, vmem_limit = 4096, None
    else:
        pref, vmem_limit = 8192, 48 << 20
    tr = rows if rows <= pref else pref
    # v7x megacore: guarantee >= 2 blocks along the single "parallel" axis so both
    # TensorCores run this HBM-bound pass; costs nothing on 1-TC chips.
    if pl.cdiv(rows, tr) == 1 and rows >= 16:
        tr = max(8, ((rows // 2 + 7) // 8) * 8)
    return tr, vmem_limit


@functools.partial(jax.jit, static_argnames=("filter_p",))
def filter_pred(pred2d, target2d, filter_p):
    """Materialize final_input (float32) -- only needed for the host-side gudhi step."""
    H, W = pred2d.shape
    N = H * W
    lane = 128
    pad = (-N) % lane

    # Lane-dense plumbing: flatten, pad minimally to a multiple of 128, view as
    # (rows, 128).  Every block is then a dense vreg-wide store regardless of W.
    pf = pred2d.reshape(-1)
    tf = target2d.reshape(-1)
    if pad:
        pf = jnp.pad(pf, (0, pad))
        tf = jnp.pad(tf, (0, pad))
    rows = (N + pad) // lane
    pf = pf.reshape(rows, lane)
    tf = tf.reshape(rows, lane)

    tr, vmem_limit = _row_tile(rows)
    cp_kwargs = dict(dimension_semantics=("parallel",))
    if vmem_limit is not None:
        cp_kwargs["vmem_limit_bytes"] = vmem_limit

    out = pl.pallas_call(
        functools.partial(_filter_kernel, filter_p=float(filter_p)),
        out_shape=jax.ShapeDtypeStruct((rows, lane), jnp.float32),
        grid=(pl.cdiv(rows, tr),),
        in_specs=[
            pl.BlockSpec((tr, lane), lambda i: (i, 0)),
            pl.BlockSpec((tr, lane), lambda i: (i, 0)),
        ],
        out_specs=pl.BlockSpec((tr, lane), lambda i: (i, 0)),
        compiler_params=pltpu.CompilerParams(**cp_kwargs),
    )(pf, tf)

    out = out.reshape(-1)
    if pad:
        out = out[:N]
    return out.reshape(H, W)


# ----------------------------------------------------------------------------
# Kernel 2: fused gather-side sigmoid + threshold filter + masked BCE
# (nn.BCELoss, reduction='mean') over critical-point values where
# final_input != target.  One call covers ALL PD pairs; emits per-pair
# (sum, count) scalars to SMEM, mean + non-empty guard taken outside.
# ----------------------------------------------------------------------------
def _fused_bce_kernel(logit_ref, tgt_ref, pid_ref, sum_ref, cnt_ref,
                      *, filter_p, num_pairs):
    z = logit_ref[...].astype(jnp.float32)
    t = tgt_ref[...].astype(jnp.float32)
    pid = pid_ref[...]                      # int32, -1 marks padding

    # Same elementwise filter as the full-image kernel, applied only to the
    # gathered points (exactly the values PyTorch reads out of final_input).
    p = jax.nn.sigmoid(z)
    fi = jnp.where((p >= filter_p) & (t > 0.5), 1.0, p)
    fi = jnp.where((p <= filter_p) & (t < 0.5), 0.0, fi)

    sel = fi != t                           # dim_input != dim_target selector

    # nn.BCELoss clamps the log terms at -100 (clamp BEFORE multiply -> no NaN).
    log_p = jnp.maximum(jnp.log(fi), -100.0)
    log_1mp = jnp.maximum(jnp.log(1.0 - fi), -100.0)
    bce = -(t * log_p + (1.0 - t) * log_1mp)

    # Hoist loop-invariant work: one masked-BCE pass and one selector cast, so the
    # per-pair body is only a compare + two reductions.
    bce_sel = jnp.where(sel, bce, 0.0)
    sel_f = sel.astype(jnp.float32)

    for k in range(num_pairs):              # tiny static loop over PD pairs
        mk = (pid == k).astype(jnp.float32)
        sum_ref[k] = jnp.sum(bce_sel * mk)
        cnt_ref[k] = jnp.sum(sel_f * mk)


@functools.partial(jax.jit, static_argnums=(4, 5))
def _masked_bce_padded(pred2d, target2d, idx, pid, filter_p, num_pairs):
    """Shape-stable (bucketed) loss path: single gather + single pallas_call."""
    # One gather HLO instead of two: pull logits and targets from a stacked array.
    # (Stack cost is a small image copy; the whole thing is one jitted executable.)
    stacked = jnp.stack([pred2d, target2d], axis=0).astype(jnp.float32)   # [2, H, W]
    g = stacked[:, idx[:, 0], idx[:, 1]]                                   # [2, Tp]

    Tp = g.shape[1]
    R = Tp // 128                       # bucket is a multiple of 1024 -> R % 8 == 0
    g_logit = g[0].reshape(R, 128)
    g_tgt = g[1].reshape(R, 128)
    pid2 = pid.reshape(R, 128)

    sums, cnts = pl.pallas_call(
        functools.partial(_fused_bce_kernel,
                          filter_p=float(filter_p), num_pairs=num_pairs),
        out_shape=(
            jax.ShapeDtypeStruct((num_pairs,), jnp.float32),
            jax.ShapeDtypeStruct((num_pairs,), jnp.float32),
        ),
        grid=(1,),
        in_specs=[
            pl.BlockSpec((R, 128), lambda i: (0, 0)),
            pl.BlockSpec((R, 128), lambda i: (0, 0)),
            pl.BlockSpec((R, 128), lambda i: (0, 0)),
        ],
        out_specs=(
            pl.BlockSpec(memory_space=pltpu.MemorySpace.SMEM),
            pl.BlockSpec(memory_space=pltpu.MemorySpace.SMEM),
        ),
    )(g_logit, g_tgt, pid2)

    # PyTorch only adds the per-pair loss when the selection is non-empty.
    per_pair = jnp.where(cnts > 0.0, sums / jnp.maximum(cnts, 1.0), 0.0)
    return jnp.sum(per_pair)


def masked_bce_from_indices(pred2d, target2d, pd_indices, filter_p, bucket=1024):
    """Sum over PD pairs of BCELoss(mean) on selected critical points."""
    num_pairs = len(pd_indices)
    idx_list, pid_list = [], []
    for k, (birth_idx, death_idx) in enumerate(pd_indices):
        overall = jnp.concatenate(
            [jnp.asarray(birth_idx, jnp.int32), jnp.asarray(death_idx, jnp.int32)],
            axis=0)                                                  # [2K, 2]
        idx_list.append(overall)
        pid_list.append(jnp.full((overall.shape[0],), k, dtype=jnp.int32))
    idx = jnp.concatenate(idx_list, axis=0)                          # [T, 2]
    pid = jnp.concatenate(pid_list, axis=0)                          # [T]

    # Bucket BEFORE the gather so the whole jitted program is shape-stable: at most
    # one compile per `bucket`-wide bucket regardless of the critical-point count.
    # Padding entries gather pixel (0, 0) but carry pid = -1 so they never count.
    T = int(idx.shape[0])
    Tp = max(bucket, ((T + bucket - 1) // bucket) * bucket)
    idx = jnp.pad(idx, ((0, Tp - T), (0, 0)))
    pid = jnp.pad(pid, (0, Tp - T), constant_values=-1)

    return _masked_bce_padded(pred2d, target2d, idx, pid, float(filter_p), num_pairs)


# ----------------------------------------------------------------------------
# CubicalLoss.forward equivalent
#   (loss='BCELoss', reduction='mean', normalization='Sigmoid',
#    max_pool=None, weight=None, filter_p=0.6, dims=[1])
# ----------------------------------------------------------------------------
def cubical_loss(pred, target, filter_p=0.6, pd_indices=None):
    """pred, target: [1, 1, H, W] (NCHW).  Returns loss of shape [1]."""
    H, W = pred.shape[-2], pred.shape[-1]
    pred2d = pred.reshape(H, W)
    target2d = target.reshape(H, W)

    # TODO(synk): get_pd_ids relies on gudhi CubicalComplex persistence
    # (cofaces_of_persistence_pairs), a sequential host-side union-find with no
    # Pallas equivalent; critical-point indices must be supplied via `pd_indices`
    # (list of (birth_idx[K,2], death_idx[K,2])).  To feed gudhi, materialize
    # final_input with filter_pred(pred2d, target2d, filter_p) and copy to host.
    if pd_indices is None or len(pd_indices) == 0:
        # Matches the len(pairs_pred[0]) == 0 branch (loss = 0).
        return jnp.zeros((1,), dtype=pred.dtype)

    loss = masked_bce_from_indices(pred2d, target2d, pd_indices, filter_p)
    return loss.reshape(1).astype(pred.dtype)


# ----------------------------------------------------------------------------
# Pure-JAX references for correctness checks.
# ----------------------------------------------------------------------------
def _filter_reference(pred2d, target2d, filter_p):
    p = jax.nn.sigmoid(pred2d.astype(jnp.float32))
    t = target2d.astype(jnp.float32)
    fi = jnp.where((p >= filter_p) & (t > 0.5), 1.0, p)
    fi = jnp.where((p <= filter_p) & (t < 0.5), 0.0, fi)
    return fi


def _loss_reference(pred2d, target2d, filter_p, pd_indices):
    fi = _filter_reference(pred2d, target2d, filter_p)
    t2 = target2d.astype(jnp.float32)
    loss = jnp.zeros((), jnp.float32)
    for birth_idx, death_idx in pd_indices:
        overall = jnp.concatenate([birth_idx, death_idx], axis=0)
        di = fi[overall[:, 0], overall[:, 1]]
        dt = t2[overall[:, 0], overall[:, 1]]
        sel = di != dt
        log_p = jnp.maximum(jnp.log(di), -100.0)
        log_1mp = jnp.maximum(jnp.log(1.0 - di), -100.0)
        bce = -(dt * log_p + (1.0 - dt) * log_1mp)
        s = jnp.sum(jnp.where(sel, bce, 0.0))
        c = jnp.sum(sel.astype(jnp.float32))
        loss = loss + jnp.where(c > 0, s / jnp.maximum(c, 1.0), 0.0)
    return loss


if __name__ == "__main__":
    key = jax.random.PRNGKey(0)
    k_pred, k_tgt = jax.random.split(key)

    H = W = 64
    pred = jax.random.normal(k_pred, (1, 1, H, W), dtype=jnp.float32)  # logits
    target = (jax.random.uniform(k_tgt, (1, 1, H, W)) > 0.5).astype(jnp.float32)
    filter_p = 0.6

    pred2d = pred.reshape(H, W)
    target2d = target.reshape(H, W)

    # Kernel 1: lane-dense tiled full-image filter (array fed to the gudhi step).
    fi = jax.block_until_ready(filter_pred(pred2d, target2d, filter_p))
    fi_ref = _filter_reference(pred2d, target2d, filter_p)
    assert fi.shape == (H, W)
    assert jnp.allclose(fi, fi_ref, rtol=1e-5, atol=1e-6)

    # Path 1: no persistence pairs available -> loss is 0 (empty-PD branch).
    loss0 = jax.block_until_ready(cubical_loss(pred, target, filter_p=filter_p))
    assert loss0.shape == (1,) and float(loss0[0]) == 0.0

    # Path 2: fused gather + filter + masked-BCE kernel with deterministic stand-in
    # critical-point indices (in real use these come from gudhi persistence).
    birth_idx = jnp.array([[0, 0], [2, 3], [5, 7], [8, 1], [13, 40], [60, 9]],
                          dtype=jnp.int32)
    death_idx = jnp.array([[1, 1], [3, 4], [6, 8], [9, 2], [14, 41], [61, 10]],
                          dtype=jnp.int32)
    pd_indices = [(birth_idx, death_idx)]
    loss1 = jax.block_until_ready(
        cubical_loss(pred, target, filter_p=filter_p, pd_indices=pd_indices))
    loss1_ref = _loss_reference(pred2d, target2d, filter_p, pd_indices)

    assert loss1.shape == (1,)
    assert bool(jnp.isfinite(loss1).all())
    assert jnp.allclose(loss1[0], loss1_ref, rtol=1e-5, atol=1e-6)

    print("KERNEL_OK")
</pallas_src>

<mosaic_0001>
module attributes {stable_mosaic.version = 11 : i64} {
  func.func @_filter_kernel(%arg0: i32, %arg1: memref<16x128xf32, #tpu.memory_space<vmem>>, %arg2: memref<16x128xf32, #tpu.memory_space<vmem>>, %arg3: memref<16x128xf32, #tpu.memory_space<vmem>>) attributes {dimension_semantics = [#tpu.dimension_semantics<parallel>], iteration_bounds = array<i64: 2>, scalar_prefetch = 0 : i64, scratch_operands = 0 : i64, tpu.core_type = #tpu.core_type<tc>, window_params = [{transform_indices = @transform_0, window_bounds = array<i64: 16, 128>}, {transform_indices = @transform_1, window_bounds = array<i64: 16, 128>}, {transform_indices = @transform_2, window_bounds = array<i64: 16, 128>}]} {
    %c0 = arith.constant 0 : index
    %c0_0 = arith.constant 0 : index
    %0 = vector.load %arg1[%c0, %c0_0] : memref<16x128xf32, #tpu.memory_space<vmem>>, vector<16x128xf32>
    %1 = arith.negf %0 : vector<16x128xf32>
    %2 = math.exp %1 : vector<16x128xf32>
    %cst = arith.constant 1.000000e+00 : f32
    %3 = vector.broadcast %cst : f32 to vector<16x128xf32>
    %4 = arith.addf %3, %2 : vector<16x128xf32>
    %5 = arith.divf %3, %4 : vector<16x128xf32>
    %c0_1 = arith.constant 0 : index
    %c0_2 = arith.constant 0 : index
    %6 = vector.load %arg2[%c0_1, %c0_2] : memref<16x128xf32, #tpu.memory_space<vmem>>, vector<16x128xf32>
    %cst_3 = arith.constant 6.000000e-01 : f32
    %7 = vector.broadcast %cst_3 : f32 to vector<16x128xf32>
    %8 = arith.cmpf oge, %5, %7 : vector<16x128xf32>
    %cst_4 = arith.constant 5.000000e-01 : f32
    %9 = vector.broadcast %cst_4 : f32 to vector<16x128xf32>
    %10 = arith.cmpf ogt, %6, %9 : vector<16x128xf32>
    %11 = arith.andi %8, %10 : vector<16x128xi1>
    %cst_5 = arith.constant 1.000000e+00 : f32
    %12 = vector.broadcast %cst_5 : f32 to vector<16x128xf32>
    %13 = arith.select %11, %12, %5 : vector<16x128xi1>, vector<16x128xf32>
    %cst_6 = arith.constant 6.000000e-01 : f32
    %14 = vector.broadcast %cst_6 : f32 to vector<16x128xf32>
    %15 = arith.cmpf ole, %5, %14 : vector<16x128xf32>
    %cst_7 = arith.constant 5.000000e-01 : f32
    %16 = vector.broadcast %cst_7 : f32 to vector<16x128xf32>
    %17 = arith.cmpf olt, %6, %16 : vector<16x128xf32>
    %18 = arith.andi %15, %17 : vector<16x128xi1>
    %cst_8 = arith.constant 0.000000e+00 : f32
    %19 = vector.broadcast %cst_8 : f32 to vector<16x128xf32>
    %20 = arith.select %18, %19, %13 : vector<16x128xi1>, vector<16x128xf32>
    %c0_9 = arith.constant 0 : index
    %c0_10 = arith.constant 0 : index
    %21 = vector.load %arg3[%c0_9, %c0_10] : memref<16x128xf32, #tpu.memory_space<vmem>>, vector<16x128xf32>
    tpu.vector_store %arg3[%c0_9, %c0_10], %20 {strides = array<i32>} : memref<16x128xf32, #tpu.memory_space<vmem>>, vector<16x128xf32>,
    return
  }
  func.func @transform_0(%arg0: i32) -> (i32, i32) {
    %c0_i32 = arith.constant 0 : i32
    %c0_i32_0 = arith.constant 0 : i32
    return %arg0, %c0_i32 : i32, i32
  }
  func.func @transform_1(%arg0: i32) -> (i32, i32) {
    %c0_i32 = arith.constant 0 : i32
    %c0_i32_0 = arith.constant 0 : i32
    return %arg0, %c0_i32 : i32, i32
  }
  func.func @transform_2(%arg0: i32) -> (i32, i32) {
    %c0_i32 = arith.constant 0 : i32
    %c0_i32_0 = arith.constant 0 : i32
    return %arg0, %c0_i32 : i32, i32
  }
}

</mosaic_0001>

<bundles_post_ra>
// kernel: filter_pred.1
= control target key start
LH: loop header
LB: loop body
LE: loop exit
PB: predicated region body
PF: predicated region fallthrough
CT: control target
= control target key end

     0   :  { %s325_s9 = smov 0   ;;  %s345_s0 = inlined_call_operand.vmem [shape: f32[32,128], index: 0, kind: input, shape index: {}]   ;;  %s346_s1 = inlined_call_operand.vmem [shape: f32[32,128], index: 1, kind: input, shape index: {}]   ;;  %s347_s2 = inlined_call_operand.vmem [shape: f32[32,128], index: 2, kind: output, shape index: {}]  }
   0x1 LB: > { %s271_s10 = sadd.s32 4294967295, %s308_s9   ;;  %p275_p0 = scmp.ge.s32.totalorder %s308_s9, 1  ;;  %s308_s9 = sphi %s325_s9, %s12_s9  }
   0x2   : > { %p124_p1 = scmp.lt.s32.totalorder %s308_s9, 3 }
   0x4   : > { %p125_p2 = pnand %p275_p0, %p124_p1 }
   0x5   : > { %s276_s11 = sshll.u32 (!%p125_p2), %s271_s10, 1 }
   0x6   : > { %128 = sbr.rel (%p125_p2) target bundleno = 50 (0x32), region = 28  ;;  %p152_p3 = scmp.lt.s32.totalorder (!%p125_p2), %s276_s11, 3 }
   0xd   : > { %s349_s11 = smov (!%p152_p3, %s276_s11), 3 }
   0xe   : > { %s277_s12 = sshll.u32 %s349_s11, 3 }
   0xf   : > { %s155_s15 = scalar_lea.vmem %s345_s0, %s277_s12  ;;  %s161_s18 = scalar_lea.vmem %s346_s1, %s277_s12 }
  0x10   : > { %v169_v0 = vld [vmem:[%s155_s15] sm:$0xff]  ;;  %v170_v1 = vld [vmem:[%s155_s15 + $0x8] sm:$0xff]  ;;  %s167_s21 = scalar_lea.vmem %s347_s2, %s277_s12 }
  0x11   : > { %v282_v2 = vmul.f32 -1.442695, %v169_v0  ;;  %v283_v3 = vmul.f32 -1.442695, %v170_v1  ;;  %v183_v8 = vld [vmem:[%s161_s18] sm:$0xff]  ;;  %v184_v9 = vld [vmem:[%s161_s18 + $0x8] sm:$0xff] }
  0x12   : > { %vm187_vm0 = vcmp.gt.f32.partialorder %v183_v8, 0.5  ;;  %vm195_vm1 = vcmp.lt.f32.partialorder %v183_v8, 0.5  ;;  %vm188_vm4 = vcmp.gt.f32.partialorder %v184_v9, 0.5  ;;  %vm196_vm8 = vcmp.lt.f32.partialorder %v184_v9, 0.5 }
  0x13   : > { %294 = vpow2.f32 %v282_v2 }
  0x14   : > { %296 = vpow2.f32 %v283_v3 }
  0x1d   : > { %v295_v4 = vpop.eup %294 }
  0x1e   : > { %v297_v5 = vpop.eup %296  ;;  %v177_v6 = vadd.f32 1.0, %v295_v4 }
  0x1f   : > { %v178_v7 = vadd.f32 1.0, %v297_v5 }
  0x20   : > { %298 = vrcp.f32 %v177_v6 }
  0x21   : > { %300 = vrcp.f32 %v178_v7 }
  0x2a   : > { %v299_v10 = vpop.eup %298 }
  0x2b   : > { %v301_v11 = vpop.eup %300  ;;  %vm185_vm2 = vcmp.ge.f32.partialorder %v299_v10, 0.6  ;;  %vm193_vm3 = vcmp.le.f32.partialorder %v299_v10, 0.6 }
  0x2c   : > { %vm189_vm5 = vmand %vm185_vm2, %vm187_vm0  ;;  %vm186_vm6 = vcmp.ge.f32.partialorder %v301_v11, 0.6  ;;  %vm194_vm7 = vcmp.le.f32.partialorder %v301_v11, 0.6 }
  0x2d   : > { %v191_v12 = vsel %vm189_vm5, 1.0, %v299_v10  ;;  %vm197_vm9 = vmand %vm193_vm3, %vm195_vm1 }
  0x2e   : > { %v199_v13 = vsel %vm197_vm9, 0.0, %v191_v12  ;;  %vm190_vm10 = vmand %vm186_vm6, %vm188_vm4 }
  0x2f   : > { %201 = vst [vmem:[%s167_s21] sm:$0xff] %v199_v13  ;;  %v192_v14 = vsel %vm190_vm10, 1.0, %v301_v11  ;;  %vm198_vm11 = vmand %vm194_vm7, %vm196_vm8 }
  0x30   : > { %v200_v15 = vsel %vm198_vm11, 0.0, %v192_v14 }
  0x31   : > { %202 = vst [vmem:[%s167_s21 + $0x8] sm:$0xff] %v200_v15 }
  0x32 PF: > { %s12_s9 = sadd.s32 1, %s308_s9  }
  0x33   : > { %p9_p4 = scmp.ge.s32.totalorder %s12_s9, 4  }
  0x35   :  { %11 = sbr.rel (!%p9_p4) target bundleno = 1 (0x1), region = 61 }

</bundles_post_ra>
